<compile_context>
chip_gen: v6e
topology: v6e:2x2x1
jax: 0.10.0
libtpu: 0.0.40
codegen_flags: <defaults>
</compile_context>

<pallas_src>
import jax
import jax.numpy as jnp
import numpy as np
from jax import lax
from jax.experimental import pallas as pl
from jax.experimental.pallas import tpu as pltpu

TM = 512      # im2col rows per conv grid step (review: 128 was pipeline-overhead bound)
C_PAD = 128   # lane-dense padded output-channel count


def _conv_stats_kernel(p_ref, w_ref, out_ref, sum_ref, ssq_ref):
    """Conv tile via MXU matmul + per-tile partial BN statistics (VPU-only reduction)."""
    acc = jnp.dot(p_ref[...], w_ref[...], preferred_element_type=jnp.float32)
    out_ref[...] = acc
    tm, c = acc.shape
    # Fold TM rows onto 8 sublanes with elementwise adds only (no full cross-sublane
    # XLU reduce, no masked (1, C) store).  Final 8 -> 1 reduction happens in plain JAX.
    a3 = acc.reshape(tm // 8, 8, c)
    sum_ref[...] = jnp.sum(a3, axis=0)
    ssq_ref[...] = jnp.sum(a3 * a3, axis=0)


def _bn_relu_pool_kernel(x_ref, scale_ref, shift_ref, o_ref):
    """Fused BN (precomputed scale/shift) + ReLU + 3x3/s2/p1 max-pool for one image.

    x_ref : (1, OH, PW, 2*C) conv output with the W axis paired into the lane dim
            (lanes [0:C] = even w, lanes [C:2C] = odd w), pre-BN.
    o_ref : (1, PH, PW, C) pooled output, PH = OH // 2, lane-dense.
    """
    C = o_ref.shape[-1]
    x = x_ref[...]
    scale = scale_ref[...].reshape(1, 1, 1, 2 * C)
    shift = shift_ref[...].reshape(1, 1, 1, 2 * C)
    act = jnp.maximum(x * scale + shift, 0.0)            # BN + ReLU (values >= 0)

    # --- W direction: taps at w = 2*pw-1, 2*pw, 2*pw+1 (left edge uses zero pad,
    #     which is safe post-ReLU; right pad is never touched for even OW).
    a_even = act[..., :C]                                 # w = 2*pw
    a_odd = act[..., C:]                                  # w = 2*pw + 1
    w_max = jnp.maximum(a_even, a_odd)
    a_left = pltpu.roll(a_odd, shift=1, axis=2)           # odd element of pair pw-1
    pw_idx = lax.broadcasted_iota(jnp.int32, a_left.shape, 2)
    a_left = jnp.where(pw_idx == 0, 0.0, a_left)          # zero pad at pw == 0
    w_pool = jnp.maximum(w_max, a_left)                   # (1, OH, PW, C)

    # --- H direction: taps at h = 2*ph-1, 2*ph, 2*ph+1 (top edge uses zero pad).
    _, OH, PW, _ = w_pool.shape
    PH = OH // 2
    h2 = w_pool.reshape(1, PH, 2, PW, C)                  # split outer dim only
    h_max = jnp.maximum(h2[:, :, 0], h2[:, :, 1])         # rows 2*ph, 2*ph+1
    h_odd = h2[:, :, 1]                                   # row 2*ph + 1
    h_left = jnp.concatenate(                             # row 2*ph - 1 (zero pad at ph==0)
        [jnp.zeros((1, 1, PW, C), h_odd.dtype), h_odd[:, :-1]], axis=1)
    o_ref[...] = jnp.maximum(h_max, h_left)


def imagenet_stem(x_nchw, conv_w_oihw, gamma, beta, eps=1e-5):
    N, Cin, H, W = x_nchw.shape
    Cout, _, KH, KW = conv_w_oihw.shape
    stride, pad = 2, 3
    OH = (H + 2 * pad - KH) // stride + 1
    OW = (W + 2 * pad - KW) // stride + 1
    assert OH % 2 == 0 and OW % 2 == 0, "fused pool assumes even conv output dims"
    PH, PW = OH // 2, OW // 2
    assert Cout <= C_PAD
    C = C_PAD

    # ---- glue: NCHW -> NHWC, pad, im2col patch extraction ---------------------------
    # TODO(synk): build im2col patch tiles in-kernel from strided slabs of the padded
    # NHWC input (pl.ANY + manual DMA / kh grid-reduction axis) to remove the remaining
    # ~12x HBM im2col materialization flagged in the review.
    x_nhwc = jnp.transpose(x_nchw, (0, 2, 3, 1)).astype(jnp.float32)
    xp = jnp.pad(x_nhwc, ((0, 0), (pad, pad), (pad, pad), (0, 0)))
    cols = []
    for kh in range(KH):
        for kw in range(KW):
            cols.append(xp[:, kh:kh + stride * (OH - 1) + 1:stride,
                              kw:kw + stride * (OW - 1) + 1:stride, :])
    patches = jnp.stack(cols, axis=3).reshape(N * OH * OW, KH * KW * Cin)

    Kdim = KH * KW * Cin
    M = N * OH * OW
    Mp = ((M + TM - 1) // TM) * TM                        # pad rows instead of asserting
    if Mp != M:
        patches = jnp.pad(patches, ((0, Mp - M), (0, 0)))  # zero rows: contribute 0 to stats
    ntiles = Mp // TM

    # weights: OIHW -> (KH*KW*Cin, Cout), zero-padded to 128 output lanes (lane-dense)
    w_mat = jnp.transpose(conv_w_oihw, (2, 3, 1, 0)).reshape(Kdim, Cout)
    w_mat = jnp.pad(w_mat.astype(jnp.float32), ((0, 0), (0, C - Cout)))

    # ---- kernel 1: conv matmul + per-tile partial BN statistics ---------------------
    conv_out, psum, pssq = pl.pallas_call(
        _conv_stats_kernel,
        out_shape=(jax.ShapeDtypeStruct((Mp, C), jnp.float32),
                   jax.ShapeDtypeStruct((ntiles * 8, C), jnp.float32),
                   jax.ShapeDtypeStruct((ntiles * 8, C), jnp.float32)),
        grid_spec=pltpu.PrefetchScalarGridSpec(
            num_scalar_prefetch=0,
            grid=(ntiles,),
            in_specs=[pl.BlockSpec((TM, Kdim), lambda i: (i, 0)),
                      pl.BlockSpec((Kdim, C), lambda i: (0, 0))],
            out_specs=(pl.BlockSpec((TM, C), lambda i: (i, 0)),
                       pl.BlockSpec((8, C), lambda i: (i, 0)),
                       pl.BlockSpec((8, C), lambda i: (i, 0)))),
        compiler_params=pltpu.CompilerParams(
            dimension_semantics=("parallel",),
            vmem_limit_bytes=32 * 1024 * 1024),
    )(patches, w_mat)

    # ---- glue: finalize BN affine (training-mode batch stats, biased variance) ------
    csum = jnp.sum(psum, axis=0)
    cssq = jnp.sum(pssq, axis=0)
    mean = csum / M
    var = cssq / M - mean * mean
    inv = 1.0 / jnp.sqrt(var + eps)
    g = jnp.pad(gamma.astype(jnp.float32), (0, C - Cout))
    b = jnp.pad(beta.astype(jnp.float32), (0, C - Cout))
    scale = g * inv
    shift = b - mean * scale
    scale2 = jnp.tile(scale, 2).reshape(1, 2 * C)         # W pairs share lanes [0:C]/[C:2C]
    shift2 = jnp.tile(shift, 2).reshape(1, 2 * C)

    # ---- kernel 2: fused BN + ReLU + 3x3/s2/p1 maxpool -------------------------------
    # Metadata-only reshape: (M, C) row-major == (N, OH, PW, 2*C) with adjacent W
    # positions paired into the lane dim -> lane-dense pool input, no 9x window stack.
    y = conv_out[:M].reshape(N, OH, PW, 2 * C)
    pooled = pl.pallas_call(
        _bn_relu_pool_kernel,
        out_shape=jax.ShapeDtypeStruct((N, PH, PW, C), jnp.float32),
        grid_spec=pltpu.PrefetchScalarGridSpec(
            num_scalar_prefetch=0,
            grid=(N,),
            in_specs=[pl.BlockSpec((1, OH, PW, 2 * C), lambda n: (n, 0, 0, 0)),
                      pl.BlockSpec((1, 2 * C), lambda n: (0, 0)),
                      pl.BlockSpec((1, 2 * C), lambda n: (0, 0))],
            out_specs=pl.BlockSpec((1, PH, PW, C), lambda n: (n, 0, 0, 0))),
        compiler_params=pltpu.CompilerParams(
            dimension_semantics=("parallel",),
            vmem_limit_bytes=32 * 1024 * 1024),
    )(y, scale2, shift2)

    # ---- glue: drop channel padding, back to NCHW ------------------------------------
    return pooled[..., :Cout].transpose(0, 3, 1, 2)


if __name__ == "__main__":
    key = jax.random.PRNGKey(0)
    k1, k2, k3, k4 = jax.random.split(key, 4)

    N, Cin, H, W = 2, 3, 32, 32
    Cout = 64
    x = jax.random.normal(k1, (N, Cin, H, W), jnp.float32)
    conv_w = jax.random.normal(k2, (Cout, Cin, 7, 7), jnp.float32) * 0.05
    gamma = 1.0 + 0.1 * jax.random.normal(k3, (Cout,), jnp.float32)
    beta = 0.1 * jax.random.normal(k4, (Cout,), jnp.float32)

    out = imagenet_stem(x, conv_w, gamma, beta)
    out = jax.block_until_ready(out)

    # pure-JAX reference (matches PyTorch training-mode forward semantics)
    eps = 1e-5
    ref_conv = lax.conv_general_dilated(
        x, conv_w, (2, 2), ((3, 3), (3, 3)),
        dimension_numbers=("NCHW", "OIHW", "NCHW"),
        precision=lax.Precision.HIGHEST)
    m = ref_conv.mean(axis=(0, 2, 3), keepdims=True)
    v = ref_conv.var(axis=(0, 2, 3), keepdims=True)
    bn = (ref_conv - m) / jnp.sqrt(v + eps) * gamma.reshape(1, -1, 1, 1) \
         + beta.reshape(1, -1, 1, 1)
    act = jnp.maximum(bn, 0.0)
    ref = lax.reduce_window(act, -jnp.inf, lax.max, (1, 1, 3, 3), (1, 1, 2, 2),
                            ((0, 0), (0, 0), (1, 1), (1, 1)))

    assert out.shape == (N, Cout, H // 4, W // 4)
    np.testing.assert_allclose(np.asarray(out), np.asarray(ref), rtol=2e-3, atol=2e-3)
    print("KERNEL_OK")
</pallas_src>

<mosaic_0001>
module attributes {stable_mosaic.version = 11 : i64} {
  func.func @_conv_stats_kernel(%arg0: i32, %arg1: memref<512x147xf32, #tpu.memory_space<vmem>>, %arg2: memref<147x128xf32, #tpu.memory_space<vmem>>, %arg3: memref<512x128xf32, #tpu.memory_space<vmem>>, %arg4: memref<8x128xf32, #tpu.memory_space<vmem>>, %arg5: memref<8x128xf32, #tpu.memory_space<vmem>>) attributes {dimension_semantics = [#tpu.dimension_semantics<parallel>], iteration_bounds = array<i64: 1>, scalar_prefetch = 0 : i64, scratch_operands = 0 : i64, tpu.core_type = #tpu.core_type<tc>, window_params = [{transform_indices = @transform_0, window_bounds = array<i64: 512, 147>}, {pipeline_mode = #tpu.pipeline_mode<synchronous>, transform_indices = @transform_1, window_bounds = array<i64: 147, 128>}, {transform_indices = @transform_2, window_bounds = array<i64: 512, 128>}, {transform_indices = @transform_3, window_bounds = array<i64: 8, 128>}, {transform_indices = @transform_4, window_bounds = array<i64: 8, 128>}]} {
    %c0 = arith.constant 0 : index
    %c0_0 = arith.constant 0 : index
    %0 = vector.load %arg1[%c0, %c0_0] : memref<512x147xf32, #tpu.memory_space<vmem>>, vector<512x147xf32>
    %c0_1 = arith.constant 0 : index
    %c0_2 = arith.constant 0 : index
    %1 = vector.load %arg2[%c0_1, %c0_2] : memref<147x128xf32, #tpu.memory_space<vmem>>, vector<147x128xf32>
    %cst = arith.constant dense<0.000000e+00> : vector<512x128xf32>
    %2 = tpu.matmul %0, %1, %cst {dimension_numbers = #tpu.dot_dimension_numbers<[1], [0], [0], [1], [0, 0, 1, 1], [], []>} : vector<512x147xf32>, vector<147x128xf32>, vector<512x128xf32> -> vector<512x128xf32>
    %c0_3 = arith.constant 0 : index
    %c0_4 = arith.constant 0 : index
    %3 = vector.load %arg3[%c0_3, %c0_4] : memref<512x128xf32, #tpu.memory_space<vmem>>, vector<512x128xf32>
    tpu.vector_store %arg3[%c0_3, %c0_4], %2 {strides = array<i32>} : memref<512x128xf32, #tpu.memory_space<vmem>>, vector<512x128xf32>,
    %4 = vector.shape_cast %2 : vector<512x128xf32> to vector<64x8x128xf32>
    %cst_5 = arith.constant dense<0.000000e+00> : vector<8x128xf32>
    %5 = vector.multi_reduction <add>, %4, %cst_5 [0] : vector<64x8x128xf32> to vector<8x128xf32>
    %c0_6 = arith.constant 0 : index
    %c0_7 = arith.constant 0 : index
    %6 = vector.load %arg4[%c0_6, %c0_7] : memref<8x128xf32, #tpu.memory_space<vmem>>, vector<8x128xf32>
    tpu.vector_store %arg4[%c0_6, %c0_7], %5 {strides = array<i32>} : memref<8x128xf32, #tpu.memory_space<vmem>>, vector<8x128xf32>,
    %7 = arith.mulf %4, %4 : vector<64x8x128xf32>
    %cst_8 = arith.constant dense<0.000000e+00> : vector<8x128xf32>
    %8 = vector.multi_reduction <add>, %7, %cst_8 [0] : vector<64x8x128xf32> to vector<8x128xf32>
    %c0_9 = arith.constant 0 : index
    %c0_10 = arith.constant 0 : index
    %9 = vector.load %arg5[%c0_9, %c0_10] : memref<8x128xf32, #tpu.memory_space<vmem>>, vector<8x128xf32>
    tpu.vector_store %arg5[%c0_9, %c0_10], %8 {strides = array<i32>} : memref<8x128xf32, #tpu.memory_space<vmem>>, vector<8x128xf32>,
    return
  }
  func.func @transform_0(%arg0: i32) -> (i32, i32) {
    %c0_i32 = arith.constant 0 : i32
    %c0_i32_0 = arith.constant 0 : i32
    return %arg0, %c0_i32 : i32, i32
  }
  func.func @transform_1(%arg0: i32) -> (i32, i32) {
    %c0_i32 = arith.constant 0 : i32
    %c0_i32_0 = arith.constant 0 : i32
    %c0_i32_1 = arith.constant 0 : i32
    return %c0_i32, %c0_i32_0 : i32, i32
  }
  func.func @transform_2(%arg0: i32) -> (i32, i32) {
    %c0_i32 = arith.constant 0 : i32
    %c0_i32_0 = arith.constant 0 : i32
    return %arg0, %c0_i32 : i32, i32
  }
  func.func @transform_3(%arg0: i32) -> (i32, i32) {
    %c0_i32 = arith.constant 0 : i32
    %c0_i32_0 = arith.constant 0 : i32
    return %arg0, %c0_i32 : i32, i32
  }
  func.func @transform_4(%arg0: i32) -> (i32, i32) {
    %c0_i32 = arith.constant 0 : i32
    %c0_i32_0 = arith.constant 0 : i32
    return %arg0, %c0_i32 : i32, i32
  }
}

</mosaic_0001>

<bundles_post_ra>
// kernel: tpu_custom_call.1
= control target key start
LH: loop header
LB: loop body
LE: loop exit
PB: predicated region body
PF: predicated region fallthrough
CT: control target
= control target key end

     0   :  { %10 = vsyncpa [#allocation3], 0  ;;  %v1217_v1 = vmov 0.0   ;;  %vm163_vm0 = vcmask 154624   ;;  %vm356_vm1 = vcmask 1042432   ;;  %s2124_s0 = inlined_call_operand.vmem [shape: f32[512,147], index: 0, kind: input, shape index: {}]   ;;  %s2125_s1 = inlined_call_operand.vmem [shape: f32[147,128], index: 1, kind: input, shape index: {}]   ;;  %s2126_s2 = inlined_call_operand.hbm [shape: f32[512,128], index: 2, kind: output, shape index: {0}]   ;;  %s2127_s3 = inlined_call_operand.hbm [shape: f32[8,128], index: 3, kind: output, shape index: {1}]   ;;  %s2128_s4 = inlined_call_operand.hbm [shape: f32[8,128], index: 4, kind: output, shape index: {2}]  }
   0x1   :  { %v159_v0 = vld [vmem:[%s2125_s1 + $0x78] sm:$0xff]  ;;  %360 = vmatprep.subr.mxu0 %v1217_v1  ;;  %v158_v2 = vld [vmem:[%s2125_s1 + $0x70] sm:$0xff]  ;;  %1109 = vmatprep.subr.mxu1 %v1217_v1  ;;  %v157_v3 = vld [vmem:[%s2125_s1 + $0x68] sm:$0xff] }
   0x2   :  { %361 = vmatpush1.msra.mxu0 %v159_v0  ;;  %1128 = vmatpush1.msra.mxu1 %v159_v0  ;;  %v156_v4 = vld [vmem:[%s2125_s1 + $0x60] sm:$0xff]  ;;  %v17_v5 = vld [vmem:[%s2124_s0 + $0x8] sm:$0xff]  ;;  %v155_v6 = vld [vmem:[%s2125_s1 + $0x58] sm:$0xff] }
   0x3   :  { %362 = vmatprep.subr.mxu0 %v1217_v1  ;;  %1110 = vmatprep.subr.mxu1 %v1217_v1  ;;  %v154_v7 = vld [vmem:[%s2125_s1 + $0x50] sm:$0xff]  ;;  %v153_v8 = vld [vmem:[%s2125_s1 + $0x48] sm:$0xff]  ;;  %v152_v9 = vld [vmem:[%s2125_s1 + $0x40] sm:$0xff] }
   0x4   :  { %363 = vmatpush1.msra.mxu0 %v158_v2  ;;  %1129 = vmatpush1.msra.mxu1 %v158_v2  ;;  %v151_v10 = vld [vmem:[%s2125_s1 + $0x38] sm:$0xff]  ;;  %v150_v11 = vld [vmem:[%s2125_s1 + $0x30] sm:$0xff]  ;;  %v149_v12 = vld [vmem:[%s2125_s1 + $0x28] sm:$0xff] }
   0x5   :  { %364 = vmatprep.subr.mxu0 %v1217_v1  ;;  %1111 = vmatprep.subr.mxu1 %v1217_v1  ;;  %v148_v13 = vld [vmem:[%s2125_s1 + $0x20] sm:$0xff]  ;;  %v147_v14 = vld [vmem:[%s2125_s1 + $0x18] sm:$0xff]  ;;  %v146_v15 = vld [vmem:[%s2125_s1 + $0x10] sm:$0xff] }
   0x6   :  { %365 = vmatpush1.msra.mxu0 %v157_v3  ;;  %1130 = vmatpush1.msra.mxu1 %v157_v3  ;;  %v145_v16 = vld [vmem:[%s2125_s1 + $0x8] sm:$0xff]  ;;  %v144_v17 = vld [vmem:[%s2125_s1] sm:$0xff]  ;;  %v162_v18 = vld [vmem:[%s2125_s1 + $0x90] sm:$0x7] }
   0x7   :  { %366 = vmatprep.subr.mxu0 %v1217_v1  ;;  %1045 = vmatprep.mubr.msk.f32.mxu0 %vm163_vm0, %v17_v5  ;;  %v161_v19 = vld [vmem:[%s2125_s1 + $0x88] sm:$0xff]  ;;  %v160_v20 = vld [vmem:[%s2125_s1 + $0x80] sm:$0xff]  ;;  %v19_v22 = vld [vmem:[%s2124_s0 + $0x18] sm:$0xff] }
   0x8   :  { %367 = vmatpush1.msra.mxu0 %v156_v4  ;;  %1112 = vmatprep.subr.mxu1 %v1217_v1  ;;  %v16_v21 = vld [vmem:[%s2124_s0] sm:$0xff]  ;;  %v81_v23 = vld [vmem:[%s2124_s0 + $0x208] sm:$0xff]  ;;  %v83_v25 = vld [vmem:[%s2124_s0 + $0x218] sm:$0xff] }
   0x9   :  { %368 = vmatprep.subr.mxu0 %v1217_v1  ;;  %1131 = vmatpush1.msra.mxu1 %v156_v4  ;;  %v80_v24 = vld [vmem:[%s2124_s0 + $0x200] sm:$0xff]  ;;  %v18_v26 = vld [vmem:[%s2124_s0 + $0x10] sm:$0xff]  ;;  %v21_v27 = vld [vmem:[%s2124_s0 + $0x28] sm:$0xff] }
   0xa   :  { %369 = vmatpush1.msra.mxu0 %v155_v6  ;;  %1113 = vmatprep.subr.mxu1 %v1217_v1  ;;  %v82_v28 = vld [vmem:[%s2124_s0 + $0x210] sm:$0xff]  ;;  %v85_v29 = vld [vmem:[%s2124_s0 + $0x228] sm:$0xff]  ;;  %v20_v30 = vld [vmem:[%s2124_s0 + $0x20] sm:$0xff] }
   0xb   :  { %370 = vmatprep.subr.mxu0 %v1217_v1  ;;  %1132 = vmatpush1.msra.mxu1 %v155_v6  ;;  %v23_v31 = vld [vmem:[%s2124_s0 + $0x38] sm:$0xff]  ;;  %v84_v32 = vld [vmem:[%s2124_s0 + $0x220] sm:$0xff]  ;;  %v22_v34 = vld [vmem:[%s2124_s0 + $0x30] sm:$0xff] }
   0xc   :  { %371 = vmatpush1.msra.mxu0 %v154_v7  ;;  %1114 = vmatprep.subr.mxu1 %v1217_v1  ;;  %v87_v33 = vld [vmem:[%s2124_s0 + $0x238] sm:$0xff]  ;;  %v25_v35 = vld [vmem:[%s2124_s0 + $0x48] sm:$0xff] }
   0xd   :  { %372 = vmatprep.subr.mxu0 %v1217_v1  ;;  %1133 = vmatpush1.msra.mxu1 %v154_v7 }
   0xe   :  { %373 = vmatpush1.msra.mxu0 %v153_v8  ;;  %1115 = vmatprep.subr.mxu1 %v1217_v1 }
   0xf   :  { %374 = vmatprep.subr.mxu0 %v1217_v1  ;;  %1134 = vmatpush1.msra.mxu1 %v153_v8 }
  0x10   :  { %375 = vmatpush1.msra.mxu0 %v152_v9  ;;  %1116 = vmatprep.subr.mxu1 %v1217_v1 }
  0x11   :  { %376 = vmatprep.subr.mxu0 %v1217_v1  ;;  %1135 = vmatpush1.msra.mxu1 %v152_v9 }
  0x12   :  { %377 = vmatpush1.msra.mxu0 %v151_v10  ;;  %1117 = vmatprep.subr.mxu1 %v1217_v1 }
  0x13   :  { %378 = vmatprep.subr.mxu0 %v1217_v1  ;;  %1136 = vmatpush1.msra.mxu1 %v151_v10 }
  0x14   :  { %379 = vmatpush1.msra.mxu0 %v150_v11  ;;  %1118 = vmatprep.subr.mxu1 %v1217_v1 }
  0x15   :  { %380 = vmatprep.subr.mxu0 %v1217_v1  ;;  %1137 = vmatpush1.msra.mxu1 %v150_v11 }
  0x16   :  { %381 = vmatpush1.msra.mxu0 %v149_v12  ;;  %1119 = vmatprep.subr.mxu1 %v1217_v1 }
  0x17   :  { %382 = vmatprep.subr.mxu0 %v1217_v1  ;;  %1138 = vmatpush1.msra.mxu1 %v149_v12 }
  0x18   :  { %383 = vmatpush1.msra.mxu0 %v148_v13  ;;  %1120 = vmatprep.subr.mxu1 %v1217_v1 }
  0x19   :  { %384 = vmatprep.subr.mxu0 %v1217_v1  ;;  %1139 = vmatpush1.msra.mxu1 %v148_v13 }
  0x1a   :  { %385 = vmatpush1.msra.mxu0 %v147_v14  ;;  %1121 = vmatprep.subr.mxu1 %v1217_v1 }
  0x1b   :  { %386 = vmatprep.subr.mxu0 %v1217_v1  ;;  %1140 = vmatpush1.msra.mxu1 %v147_v14 }
  0x1c   :  { %387 = vmatpush1.msra.mxu0 %v146_v15  ;;  %1122 = vmatprep.subr.mxu1 %v1217_v1 }
  0x1d   :  { %388 = vmatprep.subr.mxu0 %v1217_v1  ;;  %1141 = vmatpush1.msra.mxu1 %v146_v15 }
  0x1e   :  { %389 = vmatpush1.msra.mxu0 %v145_v16  ;;  %1123 = vmatprep.subr.mxu1 %v1217_v1 }
  0x1f   :  { %390 = vmatprep.subr.mxu0 %v1217_v1  ;;  %1142 = vmatpush1.msra.mxu1 %v145_v16 }
  0x20   :  { %391 = vmatpush1.msra.mxu0 %v144_v17  ;;  %1124 = vmatprep.subr.mxu1 %v1217_v1 }
  0x21   :  { %418 = vmatprep.subr.mxu0 %v1217_v1  ;;  %1143 = vmatpush1.msra.mxu1 %v144_v17 }
  0x22   :  { %1044 = vmatpush2.msk.msra.mxu0 %vm356_vm1, %v162_v18  ;;  %1125 = vmatprep.subr.mxu1 %v1217_v1 }
  0x23   :  { %420 = vmatprep.subr.mxu0 %v1217_v1  ;;  %1144 = vmatpush2.msk.msra.mxu1 %vm356_vm1, %v162_v18 }
  0x24   :  { %421 = vmatpush2.msra.mxu0 %v161_v19  ;;  %1126 = vmatprep.subr.mxu1 %v1217_v1 }
  0x25   :  { %422 = vmatprep.subr.mxu0 %v1217_v1  ;;  %1145 = vmatpush2.msra.mxu1 %v161_v19 }
  0x26   :  { %423 = vmatpush2.msra.mxu0 %v160_v20  ;;  %1127 = vmatprep.subr.mxu1 %v1217_v1 }
  0x27   :  { %425 = vmatmul.mubr.f32.vlgmr.msra.gmra.mxu0 %v16_v21  ;;  %1146 = vmatpush2.msra.mxu1 %v160_v20 }
  0x28   :  { %1046 = vmatprep.mubr.msk.f32.mxu0 %vm163_vm0, %v19_v22  ;;  %1077 = vmatprep.mubr.msk.f32.mxu1 %vm163_vm0, %v81_v23 }
  0x29   :  { %585 = vmatmul.mubr.f32.vlgmr.msra.gmra.mxu1 %v80_v24 }
  0x2a   :  { %1078 = vmatprep.mubr.msk.f32.mxu1 %vm163_vm0, %v83_v25 }
  0x2b   :  { %430 = vmatmul.mubr.f32.gmra.mxu0 %v18_v26 }
  0x2c   :  { %1047 = vmatprep.mubr.msk.f32.mxu0 %vm163_vm0, %v21_v27 }
  0x2d   :  { %590 = vmatmul.mubr.f32.gmra.mxu1 %v82_v28 }
  0x2e   :  { %1079 = vmatprep.mubr.msk.f32.mxu1 %vm163_vm0, %v85_v29 }
  0x2f   :  { %435 = vmatmul.mubr.f32.gmra.mxu0 %v20_v30 }
  0x30   :  { %1048 = vmatprep.mubr.msk.f32.mxu0 %vm163_vm0, %v23_v31 }
  0x31   :  { %595 = vmatmul.mubr.f32.gmra.mxu1 %v84_v32 }
  0x32   :  { %11 = vsyncpa [#allocation5], 0  ;;  %1080 = vmatprep.mubr.msk.f32.mxu1 %vm163_vm0, %v87_v33  ;;  %v86_v36 = vld [vmem:[%s2124_s0 + $0x230] sm:$0xff]  ;;  %v89_v37 = vld [vmem:[%s2124_s0 + $0x248] sm:$0xff] }
  0x33   :  { %440 = vmatmul.mubr.f32.gmra.mxu0 %v22_v34  ;;  %v24_v38 = vld [vmem:[%s2124_s0 + $0x40] sm:$0xff]  ;;  %v27_v39 = vld [vmem:[%s2124_s0 + $0x58] sm:$0xff]  ;;  %v26_v42 = vld [vmem:[%s2124_s0 + $0x50] sm:$0xff] }
  0x34   :  { %1049 = vmatprep.mubr.msk.f32.mxu0 %vm163_vm0, %v25_v35  ;;  %v88_v40 = vld [vmem:[%s2124_s0 + $0x240] sm:$0xff]  ;;  %v91_v41 = vld [vmem:[%s2124_s0 + $0x258] sm:$0xff]  ;;  %v29_v43 = vld [vmem:[%s2124_s0 + $0x68] sm:$0xff] }
  0x35   :  { %600 = vmatmul.mubr.f32.gmra.mxu1 %v86_v36  ;;  %v90_v44 = vld [vmem:[%s2124_s0 + $0x250] sm:$0xff]  ;;  %v93_v45 = vld [vmem:[%s2124_s0 + $0x268] sm:$0xff]  ;;  %v28_v46 = vld [vmem:[%s2124_s0 + $0x60] sm:$0xff] }
  0x36   :  { %1081 = vmatprep.mubr.msk.f32.mxu1 %vm163_vm0, %v89_v37  ;;  %v31_v47 = vld [vmem:[%s2124_s0 + $0x78] sm:$0xff]  ;;  %v92_v48 = vld [vmem:[%s2124_s0 + $0x260] sm:$0xff]  ;;  %v30_v50 = vld [vmem:[%s2124_s0 + $0x70] sm:$0xff] }
  0x37   :  { %445 = vmatmul.mubr.f32.gmra.mxu0 %v24_v38  ;;  %v95_v49 = vld [vmem:[%s2124_s0 + $0x278] sm:$0xff]  ;;  %v33_v51 = vld [vmem:[%s2124_s0 + $0x88] sm:$0xff]  ;;  %v94_v52 = vld [vmem:[%s2124_s0 + $0x270] sm:$0xff] }
  0x38   :  { %1050 = vmatprep.mubr.msk.f32.mxu0 %vm163_vm0, %v27_v39  ;;  %v97_v53 = vld [vmem:[%s2124_s0 + $0x288] sm:$0xff]  ;;  %v32_v54 = vld [vmem:[%s2124_s0 + $0x80] sm:$0xff]  ;;  %v35_v55 = vld [vmem:[%s2124_s0 + $0x98] sm:$0xff] }
  0x39   :  { %605 = vmatmul.mubr.f32.gmra.mxu1 %v88_v40  ;;  %v96_v56 = vld [vmem:[%s2124_s0 + $0x280] sm:$0xff]  ;;  %v99_v57 = vld [vmem:[%s2124_s0 + $0x298] sm:$0xff]  ;;  %v34_v58 = vld [vmem:[%s2124_s0 + $0x90] sm:$0xff] }
  0x3a   :  { %1082 = vmatprep.mubr.msk.f32.mxu1 %vm163_vm0, %v91_v41  ;;  %v37_v59 = vld [vmem:[%s2124_s0 + $0xa8] sm:$0xff]  ;;  %v98_v60 = vld [vmem:[%s2124_s0 + $0x290] sm:$0xff]  ;;  %v36_v62 = vld [vmem:[%s2124_s0 + $0xa0] sm:$0xff] }
  0x3b   :  { %450 = vmatmul.mubr.f32.gmra.mxu0 %v26_v42  ;;  %v101_v61 = vld [vmem:[%s2124_s0 + $0x2a8] sm:$0xff]  ;;  %v39_v63 = vld [vmem:[%s2124_s0 + $0xb8] sm:$0xff]  ;;  %v100_v0 = vld [vmem:[%s2124_s0 + $0x2a0] sm:$0xff] }
  0x3c   :  { %1051 = vmatprep.mubr.msk.f32.mxu0 %vm163_vm0, %v29_v43  ;;  %v103_v1 = vld [vmem:[%s2124_s0 + $0x2b8] sm:$0xff]  ;;  %v38_v2 = vld [vmem:[%s2124_s0 + $0xb0] sm:$0xff]  ;;  %v41_v3 = vld [vmem:[%s2124_s0 + $0xc8] sm:$0xff] }
  0x3d   :  { %610 = vmatmul.mubr.f32.gmra.mxu1 %v90_v44  ;;  %v102_v4 = vld [vmem:[%s2124_s0 + $0x2b0] sm:$0xff]  ;;  %v105_v5 = vld [vmem:[%s2124_s0 + $0x2c8] sm:$0xff]  ;;  %v40_v6 = vld [vmem:[%s2124_s0 + $0xc0] sm:$0xff] }
  0x3e   :  { %1083 = vmatprep.mubr.msk.f32.mxu1 %vm163_vm0, %v93_v45  ;;  %v43_v7 = vld [vmem:[%s2124_s0 + $0xd8] sm:$0xff]  ;;  %v104_v8 = vld [vmem:[%s2124_s0 + $0x2c0] sm:$0xff]  ;;  %v42_v10 = vld [vmem:[%s2124_s0 + $0xd0] sm:$0xff] }
  0x3f   :  { %455 = vmatmul.mubr.f32.gmra.mxu0 %v28_v46  ;;  %v107_v9 = vld [vmem:[%s2124_s0 + $0x2d8] sm:$0xff]  ;;  %v45_v11 = vld [vmem:[%s2124_s0 + $0xe8] sm:$0xff]  ;;  %v106_v12 = vld [vmem:[%s2124_s0 + $0x2d0] sm:$0xff] }
  0x40   :  { %1052 = vmatprep.mubr.msk.f32.mxu0 %vm163_vm0, %v31_v47  ;;  %v109_v13 = vld [vmem:[%s2124_s0 + $0x2e8] sm:$0xff]  ;;  %v44_v14 = vld [vmem:[%s2124_s0 + $0xe0] sm:$0xff]  ;;  %v47_v15 = vld [vmem:[%s2124_s0 + $0xf8] sm:$0xff] }
  0x41   :  { %615 = vmatmul.mubr.f32.gmra.mxu1 %v92_v48  ;;  %v108_v16 = vld [vmem:[%s2124_s0 + $0x2e0] sm:$0xff]  ;;  %v111_v17 = vld [vmem:[%s2124_s0 + $0x2f8] sm:$0xff]  ;;  %v46_v18 = vld [vmem:[%s2124_s0 + $0xf0] sm:$0xff] }
  0x42   :  { %1084 = vmatprep.mubr.msk.f32.mxu1 %vm163_vm0, %v95_v49  ;;  %v49_v19 = vld [vmem:[%s2124_s0 + $0x108] sm:$0xff]  ;;  %v110_v20 = vld [vmem:[%s2124_s0 + $0x2f0] sm:$0xff]  ;;  %v48_v22 = vld [vmem:[%s2124_s0 + $0x100] sm:$0xff] }
  0x43   :  { %460 = vmatmul.mubr.f32.gmra.mxu0 %v30_v50  ;;  %v113_v21 = vld [vmem:[%s2124_s0 + $0x308] sm:$0xff]  ;;  %v51_v23 = vld [vmem:[%s2124_s0 + $0x118] sm:$0xff]  ;;  %v112_v24 = vld [vmem:[%s2124_s0 + $0x300] sm:$0xff] }
  0x44   :  { %1053 = vmatprep.mubr.msk.f32.mxu0 %vm163_vm0, %v33_v51  ;;  %v115_v25 = vld [vmem:[%s2124_s0 + $0x318] sm:$0xff]  ;;  %v50_v26 = vld [vmem:[%s2124_s0 + $0x110] sm:$0xff]  ;;  %v53_v27 = vld [vmem:[%s2124_s0 + $0x128] sm:$0xff] }
  0x45   :  { %620 = vmatmul.mubr.f32.gmra.mxu1 %v94_v52  ;;  %v114_v28 = vld [vmem:[%s2124_s0 + $0x310] sm:$0xff]  ;;  %v117_v29 = vld [vmem:[%s2124_s0 + $0x328] sm:$0xff]  ;;  %v52_v30 = vld [vmem:[%s2124_s0 + $0x120] sm:$0xff] }
  0x46   :  { %1085 = vmatprep.mubr.msk.f32.mxu1 %vm163_vm0, %v97_v53  ;;  %v55_v31 = vld [vmem:[%s2124_s0 + $0x138] sm:$0xff]  ;;  %v116_v32 = vld [vmem:[%s2124_s0 + $0x320] sm:$0xff]  ;;  %v54_v34 = vld [vmem:[%s2124_s0 + $0x130] sm:$0xff] }
  0x47   :  { %465 = vmatmul.mubr.f32.gmra.mxu0 %v32_v54  ;;  %v119_v33 = vld [vmem:[%s2124_s0 + $0x338] sm:$0xff]  ;;  %v57_v35 = vld [vmem:[%s2124_s0 + $0x148] sm:$0xff]  ;;  %v118_v36 = vld [vmem:[%s2124_s0 + $0x330] sm:$0xff] }
  0x48   :  { %1054 = vmatprep.mubr.msk.f32.mxu0 %vm163_vm0, %v35_v55  ;;  %v121_v37 = vld [vmem:[%s2124_s0 + $0x348] sm:$0xff]  ;;  %v56_v38 = vld [vmem:[%s2124_s0 + $0x140] sm:$0xff]  ;;  %v59_v39 = vld [vmem:[%s2124_s0 + $0x158] sm:$0xff] }
  0x49   :  { %625 = vmatmul.mubr.f32.gmra.mxu1 %v96_v56  ;;  %v120_v40 = vld [vmem:[%s2124_s0 + $0x340] sm:$0xff]  ;;  %v123_v41 = vld [vmem:[%s2124_s0 + $0x358] sm:$0xff]  ;;  %v58_v42 = vld [vmem:[%s2124_s0 + $0x150] sm:$0xff] }
  0x4a   :  { %1086 = vmatprep.mubr.msk.f32.mxu1 %vm163_vm0, %v99_v57  ;;  %v61_v43 = vld [vmem:[%s2124_s0 + $0x168] sm:$0xff]  ;;  %v122_v44 = vld [vmem:[%s2124_s0 + $0x350] sm:$0xff]  ;;  %v60_v46 = vld [vmem:[%s2124_s0 + $0x160] sm:$0xff] }
  0x4b   :  { %470 = vmatmul.mubr.f32.gmra.mxu0 %v34_v58  ;;  %v125_v45 = vld [vmem:[%s2124_s0 + $0x368] sm:$0xff]  ;;  %v63_v47 = vld [vmem:[%s2124_s0 + $0x178] sm:$0xff]  ;;  %v124_v48 = vld [vmem:[%s2124_s0 + $0x360] sm:$0xff] }
  0x4c   :  { %1055 = vmatprep.mubr.msk.f32.mxu0 %vm163_vm0, %v37_v59  ;;  %v127_v49 = vld [vmem:[%s2124_s0 + $0x378] sm:$0xff]  ;;  %v62_v50 = vld [vmem:[%s2124_s0 + $0x170] sm:$0xff]  ;;  %v65_v51 = vld [vmem:[%s2124_s0 + $0x188] sm:$0xff] }
  0x4d   :  { %630 = vmatmul.mubr.f32.gmra.mxu1 %v98_v60  ;;  %v126_v52 = vld [vmem:[%s2124_s0 + $0x370] sm:$0xff]  ;;  %v129_v53 = vld [vmem:[%s2124_s0 + $0x388] sm:$0xff]  ;;  %v64_v54 = vld [vmem:[%s2124_s0 + $0x180] sm:$0xff] }
  0x4e   :  { %1087 = vmatprep.mubr.msk.f32.mxu1 %vm163_vm0, %v101_v61  ;;  %v67_v55 = vld [vmem:[%s2124_s0 + $0x198] sm:$0xff]  ;;  %v128_v56 = vld [vmem:[%s2124_s0 + $0x380] sm:$0xff]  ;;  %v66_v58 = vld [vmem:[%s2124_s0 + $0x190] sm:$0xff] }
  0x4f   :  { %475 = vmatmul.mubr.f32.gmra.mxu0 %v36_v62  ;;  %v131_v57 = vld [vmem:[%s2124_s0 + $0x398] sm:$0xff]  ;;  %v69_v59 = vld [vmem:[%s2124_s0 + $0x1a8] sm:$0xff]  ;;  %v130_v60 = vld [vmem:[%s2124_s0 + $0x390] sm:$0xff] }
  0x50   :  { %1056 = vmatprep.mubr.msk.f32.mxu0 %vm163_vm0, %v39_v63  ;;  %v133_v61 = vld [vmem:[%s2124_s0 + $0x3a8] sm:$0xff]  ;;  %v68_v62 = vld [vmem:[%s2124_s0 + $0x1a0] sm:$0xff]  ;;  %v71_v63 = vld [vmem:[%s2124_s0 + $0x1b8] sm:$0xff] }
  0x51   :  { %635 = vmatmul.mubr.f32.gmra.mxu1 %v100_v0  ;;  %v132_v0 = vld [vmem:[%s2124_s0 + $0x3a0] sm:$0xff] }
  0x52   :  { %1088 = vmatprep.mubr.msk.f32.mxu1 %vm163_vm0, %v103_v1  ;;  %v135_v1 = vld [vmem:[%s2124_s0 + $0x3b8] sm:$0xff] }
  0x53   :  { %480 = vmatmul.mubr.f32.gmra.mxu0 %v38_v2  ;;  %v70_v2 = vld [vmem:[%s2124_s0 + $0x1b0] sm:$0xff] }
  0x54   :  { %1057 = vmatprep.mubr.msk.f32.mxu0 %vm163_vm0, %v41_v3  ;;  %v73_v3 = vld [vmem:[%s2124_s0 + $0x1c8] sm:$0xff] }
  0x55   :  { %640 = vmatmul.mubr.f32.gmra.mxu1 %v102_v4  ;;  %v134_v4 = vld [vmem:[%s2124_s0 + $0x3b0] sm:$0xff] }
  0x56   :  { %1089 = vmatprep.mubr.msk.f32.mxu1 %vm163_vm0, %v105_v5  ;;  %v137_v5 = vld [vmem:[%s2124_s0 + $0x3c8] sm:$0xff] }
  0x57   :  { %485 = vmatmul.mubr.f32.gmra.mxu0 %v40_v6  ;;  %v72_v6 = vld [vmem:[%s2124_s0 + $0x1c0] sm:$0xff] }
  0x58   :  { %1058 = vmatprep.mubr.msk.f32.mxu0 %vm163_vm0, %v43_v7  ;;  %v75_v7 = vld [vmem:[%s2124_s0 + $0x1d8] sm:$0xff] }
  0x59   :  { %645 = vmatmul.mubr.f32.gmra.mxu1 %v104_v8  ;;  %v136_v8 = vld [vmem:[%s2124_s0 + $0x3c0] sm:$0xff] }
  0x5a   :  { %1090 = vmatprep.mubr.msk.f32.mxu1 %vm163_vm0, %v107_v9  ;;  %v139_v9 = vld [vmem:[%s2124_s0 + $0x3d8] sm:$0xff] }
  0x5b   :  { %490 = vmatmul.mubr.f32.gmra.mxu0 %v42_v10  ;;  %v74_v10 = vld [vmem:[%s2124_s0 + $0x1d0] sm:$0xff] }
  0x5c   :  { %1059 = vmatprep.mubr.msk.f32.mxu0 %vm163_vm0, %v45_v11  ;;  %v77_v11 = vld [vmem:[%s2124_s0 + $0x1e8] sm:$0xff] }
  0x5d   :  { %650 = vmatmul.mubr.f32.gmra.mxu1 %v106_v12  ;;  %v138_v12 = vld [vmem:[%s2124_s0 + $0x3d0] sm:$0xff] }
  0x5e   :  { %1091 = vmatprep.mubr.msk.f32.mxu1 %vm163_vm0, %v109_v13  ;;  %v141_v13 = vld [vmem:[%s2124_s0 + $0x3e8] sm:$0xff] }
  0x5f   :  { %495 = vmatmul.mubr.f32.gmra.mxu0 %v44_v14  ;;  %v76_v14 = vld [vmem:[%s2124_s0 + $0x1e0] sm:$0xff] }
  0x60   :  { %1060 = vmatprep.mubr.msk.f32.mxu0 %vm163_vm0, %v47_v15  ;;  %v79_v15 = vld [vmem:[%s2124_s0 + $0x1f8] sm:$0xff] }
  0x61   :  { %655 = vmatmul.mubr.f32.gmra.mxu1 %v108_v16  ;;  %v140_v16 = vld [vmem:[%s2124_s0 + $0x3e0] sm:$0xff] }
  0x62   :  { %1092 = vmatprep.mubr.msk.f32.mxu1 %vm163_vm0, %v111_v17  ;;  %v143_v17 = vld [vmem:[%s2124_s0 + $0x3f8] sm:$0xff] }
  0x63   :  { %500 = vmatmul.mubr.f32.gmra.mxu0 %v46_v18  ;;  %v78_v18 = vld [vmem:[%s2124_s0 + $0x1f0] sm:$0xff] }
  0x64   :  { %1061 = vmatprep.mubr.msk.f32.mxu0 %vm163_vm0, %v49_v19  ;;  %v142_v19 = vld [vmem:[%s2124_s0 + $0x3f0] sm:$0xff]  ;;  %s1218_s0 = smov [#allocation2]  }
  0x65   :  { %660 = vmatmul.mubr.f32.gmra.mxu1 %v110_v20  ;;  %s1006_s13 = sshll.u32 %s1218_s0, 4  ;;  %s1007_s13 = int_to_ptr.vmem [resolvable:$true] %s1006_s13 }
  0x66   :  { %1093 = vmatprep.mubr.msk.f32.mxu1 %vm163_vm0, %v113_v21  ;;  %s1153_s14 = scalar_lea.vmem %s1007_s13, 8192  ;;  %p1158_p1 = scmp.lt.s32.totalorder %s1007_s13, %s1007_s13 }
  0x67   :  { %505 = vmatmul.mubr.f32.gmra.mxu0 %v48_v22  ;;  %p1154_p0 = scmp.ne.s32.totalorder %s1007_s13, %s1153_s14  ;;  %p1159_p2 = scmp.lt.s32.totalorder %s1153_s14, %s1153_s14 }
  0x68   :  { %1062 = vmatprep.mubr.msk.f32.mxu0 %vm163_vm0, %v51_v23 }
  0x69   :  { %665 = vmatmul.mubr.f32.gmra.mxu1 %v112_v24  ;;  %p1160_p3 = por %p1159_p2, %p1158_p1 }
  0x6a   :  { %1094 = vmatprep.mubr.msk.f32.mxu1 %vm163_vm0, %v115_v25 }
  0x6b   :  { %510 = vmatmul.mubr.f32.gmra.mxu0 %v50_v26  ;;  %p1161_p4 = pnand %p1160_p3, %p1154_p0 }
  0x6c   :  { %1063 = vmatprep.mubr.msk.f32.mxu0 %vm163_vm0, %v53_v27 }
  0x6d   :  { %670 = vmatmul.mubr.f32.gmra.mxu1 %v114_v28 }
  0x6e   :  { %1095 = vmatprep.mubr.msk.f32.mxu1 %vm163_vm0, %v117_v29 }
  0x6f   :  { %515 = vmatmul.mubr.f32.gmra.mxu0 %v52_v30 }
  0x70   :  { %1064 = vmatprep.mubr.msk.f32.mxu0 %vm163_vm0, %v55_v31 }
  0x71   :  { %675 = vmatmul.mubr.f32.gmra.mxu1 %v116_v32 }
  0x72   :  { %1096 = vmatprep.mubr.msk.f32.mxu1 %vm163_vm0, %v119_v33 }
  0x73   :  { %520 = vmatmul.mubr.f32.gmra.mxu0 %v54_v34 }
  0x74   :  { %1065 = vmatprep.mubr.msk.f32.mxu0 %vm163_vm0, %v57_v35 }
  0x75   :  { %680 = vmatmul.mubr.f32.gmra.mxu1 %v118_v36 }
  0x76   :  { %1097 = vmatprep.mubr.msk.f32.mxu1 %vm163_vm0, %v121_v37 }
  0x77   :  { %525 = vmatmul.mubr.f32.gmra.mxu0 %v56_v38 }
  0x78   :  { %1066 = vmatprep.mubr.msk.f32.mxu0 %vm163_vm0, %v59_v39 }
  0x79   :  { %685 = vmatmul.mubr.f32.gmra.mxu1 %v120_v40 }
  0x7a   :  { %1098 = vmatprep.mubr.msk.f32.mxu1 %vm163_vm0, %v123_v41 }
  0x7b   :  { %530 = vmatmul.mubr.f32.gmra.mxu0 %v58_v42 }
  0x7c   :  { %1067 = vmatprep.mubr.msk.f32.mxu0 %vm163_vm0, %v61_v43 }
  0x7d   :  { %690 = vmatmul.mubr.f32.gmra.mxu1 %v122_v44 }
  0x7e   :  { %1099 = vmatprep.mubr.msk.f32.mxu1 %vm163_vm0, %v125_v45 }
  0x7f   :  { %535 = vmatmul.mubr.f32.gmra.mxu0 %v60_v46 }
  0x80   :  { %1068 = vmatprep.mubr.msk.f32.mxu0 %vm163_vm0, %v63_v47 }
  0x81   :  { %695 = vmatmul.mubr.f32.gmra.mxu1 %v124_v48 }
  0x82   :  { %1100 = vmatprep.mubr.msk.f32.mxu1 %vm163_vm0, %v127_v49 }
  0x83   :  { %540 = vmatmul.mubr.f32.gmra.mxu0 %v62_v50 }
  0x84   :  { %1069 = vmatprep.mubr.msk.f32.mxu0 %vm163_vm0, %v65_v51 }
  0x85   :  { %700 = vmatmul.mubr.f32.gmra.mxu1 %v126_v52 }
  0x86   :  { %1101 = vmatprep.mubr.msk.f32.mxu1 %vm163_vm0, %v129_v53 }
  0x87   :  { %545 = vmatmul.mubr.f32.gmra.mxu0 %v64_v54 }
  0x88   :  { %1070 = vmatprep.mubr.msk.f32.mxu0 %vm163_vm0, %v67_v55 }
  0x89   :  { %705 = vmatmul.mubr.f32.gmra.mxu1 %v128_v56 }
  0x8a   :  { %1102 = vmatprep.mubr.msk.f32.mxu1 %vm163_vm0, %v131_v57 }
  0x8b   :  { %550 = vmatmul.mubr.f32.gmra.mxu0 %v66_v58 }
  0x8c   :  { %1071 = vmatprep.mubr.msk.f32.mxu0 %vm163_vm0, %v69_v59 }
  0x8d   :  { %710 = vmatmul.mubr.f32.gmra.mxu1 %v130_v60 }
  0x8e   :  { %1103 = vmatprep.mubr.msk.f32.mxu1 %vm163_vm0, %v133_v61 }
  0x8f   :  { %555 = vmatmul.mubr.f32.gmra.mxu0 %v68_v62 }
  0x90   :  { %1072 = vmatprep.mubr.msk.f32.mxu0 %vm163_vm0, %v71_v63 }
  0x91   :  { %715 = vmatmul.mubr.f32.gmra.mxu1 %v132_v0 }
  0x92   :  { %1104 = vmatprep.mubr.msk.f32.mxu1 %vm163_vm0, %v135_v1 }
  0x93   :  { %560 = vmatmul.mubr.f32.gmra.mxu0 %v70_v2 }
  0x94   :  { %1073 = vmatprep.mubr.msk.f32.mxu0 %vm163_vm0, %v73_v3 }
  0x95   :  { %720 = vmatmul.mubr.f32.gmra.mxu1 %v134_v4 }
  0x96   :  { %1105 = vmatprep.mubr.msk.f32.mxu1 %vm163_vm0, %v137_v5 }
  0x97   :  { %565 = vmatmul.mubr.f32.gmra.mxu0 %v72_v6 }
  0x98   :  { %1074 = vmatprep.mubr.msk.f32.mxu0 %vm163_vm0, %v75_v7 }
  0x99   :  { %725 = vmatmul.mubr.f32.gmra.mxu1 %v136_v8 }
  0x9a   :  { %1106 = vmatprep.mubr.msk.f32.mxu1 %vm163_vm0, %v139_v9 }
  0x9b   :  { %570 = vmatmul.mubr.f32.gmra.mxu0 %v74_v10 }
  0x9c   :  { %1075 = vmatprep.mubr.msk.f32.mxu0 %vm163_vm0, %v77_v11 }
  0x9d   :  { %730 = vmatmul.mubr.f32.gmra.mxu1 %v138_v12 }
  0x9e   :  { %1107 = vmatprep.mubr.msk.f32.mxu1 %vm163_vm0, %v141_v13 }
  0x9f   :  { %575 = vmatmul.mubr.f32.gmra.mxu0 %v76_v14 }
  0xa0   :  { %1076 = vmatprep.mubr.msk.f32.mxu0 %vm163_vm0, %v79_v15 }
  0xa1   :  { %735 = vmatmul.mubr.f32.gmra.mxu1 %v140_v16 }
  0xa2   :  { %1108 = vmatprep.mubr.msk.f32.mxu1 %vm163_vm0, %v143_v17 }
  0xa3   :  { %580 = vmatmul.mubr.f32.gmra.mxu0 %v78_v18 }
  0xa5   :  { %740 = vmatmul.mubr.f32.gmra.mxu1 %v142_v19 }
  0xe7   :  { %v1791_v20 = vpop.f32.mrf.mxu0 }
  0xe8   :  { %745 = vst [vmem:[#allocation2] sm:$0xff] %v1791_v20 }
  0xe9   :  { %v428_v21 = vpop.f32.mrf.mxu0  ;;  %v1794_v22 = vpop.f32.mrf.mxu1 }
  0xea   :  { %777 = vst [vmem:[#allocation2 + $0x100] sm:$0xff] %v1794_v22 }
  0xeb   :  { %v1797_v23 = vpop.f32.mrf.mxu0  ;;  %v588_v24 = vpop.f32.mrf.mxu1 }
  0xec   :  { %746 = vst [vmem:[#allocation2 + $0x8] sm:$0xff] %v1797_v23  ;;  %v874_v19 = vmul.f32 %v1797_v23, %v1797_v23 }
  0xed   :  { %v433_v25 = vpop.f32.mrf.mxu0  ;;  %v1800_v26 = vpop.f32.mrf.mxu1 }
  0xee   :  { %778 = vst [vmem:[#allocation2 + $0x108] sm:$0xff] %v1800_v26  ;;  %v873_v25 = vmul.f32 %v1791_v20, %v1791_v20 }
  0xef   :  { %v1803_v27 = vpop.f32.mrf.mxu0  ;;  %v593_v28 = vpop.f32.mrf.mxu1 }
  0xf0   :  { %747 = vst [vmem:[#allocation2 + $0x10] sm:$0xff] %v1803_v27  ;;  %v809_v28 = vadd.f32 %v1797_v23, %v1791_v20 }
  0xf1   :  { %v438_v29 = vpop.f32.mrf.mxu0  ;;  %v1806_v30 = vpop.f32.mrf.mxu1 }
  0xf2   :  { %779 = vst [vmem:[#allocation2 + $0x110] sm:$0xff] %v1806_v30  ;;  %v875_v29 = vmul.f32 %v1803_v27, %v1803_v27 }
  0xf3   :  { %v1809_v31 = vpop.f32.mrf.mxu0  ;;  %v598_v32 = vpop.f32.mrf.mxu1 }
  0xf4   :  { %748 = vst [vmem:[#allocation2 + $0x18] sm:$0xff] %v1809_v31 }
  0xf5   :  { %v443_v33 = vpop.f32.mrf.mxu0  ;;  %v1812_v34 = vpop.f32.mrf.mxu1 }
  0xf6   :  { %780 = vst [vmem:[#allocation2 + $0x118] sm:$0xff] %v1812_v34 }
  0xf7   :  { %v1815_v35 = vpop.f32.mrf.mxu0  ;;  %v603_v36 = vpop.f32.mrf.mxu1 }
  0xf8   :  { %749 = vst [vmem:[#allocation2 + $0x20] sm:$0xff] %v1815_v35  ;;  %v937_v36 = vadd.f32 %v874_v19, %v873_v25 }
  0xf9   :  { %v448_v37 = vpop.f32.mrf.mxu0  ;;  %v1818_v38 = vpop.f32.mrf.mxu1 }
  0xfa   :  { %781 = vst [vmem:[#allocation2 + $0x120] sm:$0xff] %v1818_v38  ;;  %v810_v37 = vadd.f32 %v809_v28, %v1803_v27  ;;  %v938_v20 = vadd.f32 %v937_v36, %v875_v29 }
  0xfb   :  { %v1821_v39 = vpop.f32.mrf.mxu0  ;;  %v608_v40 = vpop.f32.mrf.mxu1 }
  0xfc   :  { %750 = vst [vmem:[#allocation2 + $0x28] sm:$0xff] %v1821_v39  ;;  %v876_v40 = vmul.f32 %v1809_v31, %v1809_v31  ;;  %v811_v23 = vadd.f32 %v810_v37, %v1809_v31 }
  0xfd   :  { %v453_v41 = vpop.f32.mrf.mxu0  ;;  %v1824_v42 = vpop.f32.mrf.mxu1 }
  0xfe   :  { %782 = vst [vmem:[#allocation2 + $0x128] sm:$0xff] %v1824_v42  ;;  %v939_v27 = vadd.f32 %v938_v20, %v876_v40 }
  0xff   :  { %v1827_v43 = vpop.f32.mrf.mxu0  ;;  %v613_v44 = vpop.f32.mrf.mxu1 }
 0x100   :  { %751 = vst [vmem:[#allocation2 + $0x30] sm:$0xff] %v1827_v43 }
 0x101   :  { %v458_v45 = vpop.f32.mrf.mxu0  ;;  %v1830_v46 = vpop.f32.mrf.mxu1 }
 0x102   :  { %783 = vst [vmem:[#allocation2 + $0x130] sm:$0xff] %v1830_v46  ;;  %v877_v45 = vmul.f32 %v1815_v35, %v1815_v35 }
 0x103   :  { %v1833_v47 = vpop.f32.mrf.mxu0  ;;  %v618_v48 = vpop.f32.mrf.mxu1 }
 0x104   :  { %752 = vst [vmem:[#allocation2 + $0x38] sm:$0xff] %v1833_v47  ;;  %v940_v31 = vadd.f32 %v939_v27, %v877_v45 }
 0x105   :  { %v463_v49 = vpop.f32.mrf.mxu0  ;;  %v1836_v50 = vpop.f32.mrf.mxu1 }
 0x106   :  { %784 = vst [vmem:[#allocation2 + $0x138] sm:$0xff] %v1836_v50 }
 0x107   :  { %v1839_v51 = vpop.f32.mrf.mxu0  ;;  %v623_v52 = vpop.f32.mrf.mxu1 }
 0x108   :  { %753 = vst [vmem:[#allocation2 + $0x40] sm:$0xff] %v1839_v51  ;;  %v812_v52 = vadd.f32 %v811_v23, %v1815_v35 }
 0x109   :  { %v468_v53 = vpop.f32.mrf.mxu0  ;;  %v1842_v54 = vpop.f32.mrf.mxu1 }
 0x10a   :  { %785 = vst [vmem:[#allocation2 + $0x140] sm:$0xff] %v1842_v54  ;;  %v878_v53 = vmul.f32 %v1821_v39, %v1821_v39 }
 0x10b   :  { %v1845_v55 = vpop.f32.mrf.mxu0  ;;  %v628_v56 = vpop.f32.mrf.mxu1 }
 0x10c   :  { %754 = vst [vmem:[#allocation2 + $0x48] sm:$0xff] %v1845_v55  ;;  %v941_v35 = vadd.f32 %v940_v31, %v878_v53 }
 0x10d   :  { %v473_v57 = vpop.f32.mrf.mxu0  ;;  %v1848_v58 = vpop.f32.mrf.mxu1 }
 0x10e   :  { %786 = vst [vmem:[#allocation2 + $0x148] sm:$0xff] %v1848_v58 }
 0x10f   :  { %v1851_v59 = vpop.f32.mrf.mxu0  ;;  %v633_v60 = vpop.f32.mrf.mxu1 }
 0x110   :  { %755 = vst [vmem:[#allocation2 + $0x50] sm:$0xff] %v1851_v59  ;;  %v813_v60 = vadd.f32 %v812_v52, %v1821_v39 }
 0x111   :  { %v478_v61 = vpop.f32.mrf.mxu0  ;;  %v1854_v62 = vpop.f32.mrf.mxu1 }
 0x112   :  { %787 = vst [vmem:[#allocation2 + $0x150] sm:$0xff] %v1854_v62  ;;  %v879_v61 = vmul.f32 %v1827_v43, %v1827_v43 }
 0x113   :  { %v1857_v63 = vpop.f32.mrf.mxu0  ;;  %v638_v0 = vpop.f32.mrf.mxu1 }
 0x114   :  { %756 = vst [vmem:[#allocation2 + $0x58] sm:$0xff] %v1857_v63  ;;  %v942_v39 = vadd.f32 %v941_v35, %v879_v61 }
 0x115   :  { %v483_v1 = vpop.f32.mrf.mxu0  ;;  %v1860_v2 = vpop.f32.mrf.mxu1 }
 0x116   :  { %788 = vst [vmem:[#allocation2 + $0x158] sm:$0xff] %v1860_v2 }
 0x117   :  { %v1863_v3 = vpop.f32.mrf.mxu0  ;;  %v643_v4 = vpop.f32.mrf.mxu1 }
 0x118   :  { %757 = vst [vmem:[#allocation2 + $0x60] sm:$0xff] %v1863_v3  ;;  %v814_v4 = vadd.f32 %v813_v60, %v1827_v43 }
 0x119   :  { %v488_v5 = vpop.f32.mrf.mxu0  ;;  %v1866_v6 = vpop.f32.mrf.mxu1 }
 0x11a   :  { %789 = vst [vmem:[#allocation2 + $0x160] sm:$0xff] %v1866_v6  ;;  %v880_v5 = vmul.f32 %v1833_v47, %v1833_v47 }
 0x11b   :  { %v1869_v7 = vpop.f32.mrf.mxu0  ;;  %v648_v8 = vpop.f32.mrf.mxu1 }
 0x11c   :  { %758 = vst [vmem:[#allocation2 + $0x68] sm:$0xff] %v1869_v7  ;;  %v943_v43 = vadd.f32 %v942_v39, %v880_v5 }
 0x11d   :  { %v493_v9 = vpop.f32.mrf.mxu0  ;;  %v1872_v10 = vpop.f32.mrf.mxu1 }
 0x11e   :  { %790 = vst [vmem:[#allocation2 + $0x168] sm:$0xff] %v1872_v10 }
 0x11f   :  { %v1875_v11 = vpop.f32.mrf.mxu0  ;;  %v653_v12 = vpop.f32.mrf.mxu1 }
 0x120   :  { %759 = vst [vmem:[#allocation2 + $0x70] sm:$0xff] %v1875_v11  ;;  %v815_v12 = vadd.f32 %v814_v4, %v1833_v47 }
 0x121   :  { %v498_v13 = vpop.f32.mrf.mxu0  ;;  %v1878_v14 = vpop.f32.mrf.mxu1 }
 0x122   :  { %791 = vst [vmem:[#allocation2 + $0x170] sm:$0xff] %v1878_v14  ;;  %v881_v13 = vmul.f32 %v1839_v51, %v1839_v51  ;;  %v816_v19 = vadd.f32 %v815_v12, %v1839_v51 }
 0x123   :  { %v1881_v15 = vpop.f32.mrf.mxu0  ;;  %v658_v16 = vpop.f32.mrf.mxu1 }
 0x124   :  { %760 = vst [vmem:[#allocation2 + $0x78] sm:$0xff] %v1881_v15  ;;  %v944_v47 = vadd.f32 %v943_v43, %v881_v13  ;;  %v817_v29 = vadd.f32 %v816_v19, %v1845_v55 }
 0x125   :  { %v503_v17 = vpop.f32.mrf.mxu0  ;;  %v1884_v18 = vpop.f32.mrf.mxu1 }
 0x126   :  { %792 = vst [vmem:[#allocation2 + $0x178] sm:$0xff] %v1884_v18  ;;  %v818_v40 = vadd.f32 %v817_v29, %v1851_v59 }
 0x127   :  { %v1889_v21 = vpop.f32.mrf.mxu0  ;;  %v663_v24 = vpop.f32.mrf.mxu1 }
 0x128   :  { %761 = vst [vmem:[#allocation2 + $0x80] sm:$0xff] %v1889_v21  ;;  %v882_v24 = vmul.f32 %v1845_v55, %v1845_v55  ;;  %v819_v45 = vadd.f32 %v818_v40, %v1857_v63 }
 0x129   :  { %v508_v32 = vpop.f32.mrf.mxu0  ;;  %v1898_v33 = vpop.f32.mrf.mxu1 }
 0x12a   :  { %793 = vst [vmem:[#allocation2 + $0x180] sm:$0xff] %v1898_v33  ;;  %v883_v32 = vmul.f32 %v1851_v59, %v1851_v59  ;;  %v945_v51 = vadd.f32 %v944_v47, %v882_v24  ;;  %v820_v53 = vadd.f32 %v819_v45, %v1863_v3 }
 0x12b   :  { %v1904_v41 = vpop.f32.mrf.mxu0  ;;  %v668_v44 = vpop.f32.mrf.mxu1 }
 0x12c   :  { %762 = vst [vmem:[#allocation2 + $0x88] sm:$0xff] %v1904_v41  ;;  %v884_v44 = vmul.f32 %v1857_v63, %v1857_v63  ;;  %v946_v55 = vadd.f32 %v945_v51, %v883_v32  ;;  %v821_v63 = vadd.f32 %v820_v53, %v1869_v7 }
 0x12d   :  { %v513_v48 = vpop.f32.mrf.mxu0  ;;  %v1910_v49 = vpop.f32.mrf.mxu1 }
 0x12e   :  { %794 = vst [vmem:[#allocation2 + $0x188] sm:$0xff] %v1910_v49  ;;  %v885_v48 = vmul.f32 %v1863_v3, %v1863_v3  ;;  %v947_v59 = vadd.f32 %v946_v55, %v884_v44  ;;  %v822_v3 = vadd.f32 %v821_v63, %v1875_v11 }
 0x12f   :  { %v1916_v56 = vpop.f32.mrf.mxu0  ;;  %v673_v57 = vpop.f32.mrf.mxu1 }
 0x130   :  { %763 = vst [vmem:[#allocation2 + $0x90] sm:$0xff] %v1916_v56  ;;  %v886_v57 = vmul.f32 %v1869_v7, %v1869_v7  ;;  %v948_v61 = vadd.f32 %v947_v59, %v885_v48  ;;  %v823_v7 = vadd.f32 %v822_v3, %v1881_v15 }
 0x131   :  { %v518_v0 = vpop.f32.mrf.mxu0  ;;  %v1922_v1 = vpop.f32.mrf.mxu1 }
 0x132   :  { %795 = vst [vmem:[#allocation2 + $0x190] sm:$0xff] %v1922_v1  ;;  %v887_v0 = vmul.f32 %v1875_v11, %v1875_v11  ;;  %v949_v5 = vadd.f32 %v948_v61, %v886_v57  ;;  %v824_v11 = vadd.f32 %v823_v7, %v1889_v21 }
 0x133   :  { %v1928_v8 = vpop.f32.mrf.mxu0  ;;  %v678_v9 = vpop.f32.mrf.mxu1 }
 0x134   :  { %764 = vst [vmem:[#allocation2 + $0x98] sm:$0xff] %v1928_v8  ;;  %v888_v9 = vmul.f32 %v1881_v15, %v1881_v15  ;;  %v950_v13 = vadd.f32 %v949_v5, %v887_v0  ;;  %v825_v15 = vadd.f32 %v824_v11, %v1904_v41 }
 0x135   :  { %v523_v16 = vpop.f32.mrf.mxu0  ;;  %v1934_v17 = vpop.f32.mrf.mxu1 }
 0x136   :  { %796 = vst [vmem:[#allocation2 + $0x198] sm:$0xff] %v1934_v17  ;;  %v889_v16 = vmul.f32 %v1889_v21, %v1889_v21  ;;  %v951_v24 = vadd.f32 %v950_v13, %v888_v9  ;;  %v826_v21 = vadd.f32 %v825_v15, %v1916_v56 }
 0x137   :  { %v1940_v25 = vpop.f32.mrf.mxu0  ;;  %v683_v28 = vpop.f32.mrf.mxu1 }
 0x138   :  { %765 = vst [vmem:[#allocation2 + $0xa0] sm:$0xff] %v1940_v25  ;;  %v890_v28 = vmul.f32 %v1904_v41, %v1904_v41  ;;  %v952_v32 = vadd.f32 %v951_v24, %v889_v16  ;;  %v827_v41 = vadd.f32 %v826_v21, %v1928_v8 }
 0x139   :  { %v528_v36 = vpop.f32.mrf.mxu0  ;;  %v1946_v37 = vpop.f32.mrf.mxu1 }
 0x13a   :  { %797 = vst [vmem:[#allocation2 + $0x1a0] sm:$0xff] %v1946_v37  ;;  %v891_v36 = vmul.f32 %v1916_v56, %v1916_v56  ;;  %v953_v44 = vadd.f32 %v952_v32, %v890_v28  ;;  %v828_v56 = vadd.f32 %v827_v41, %v1940_v25 }
 0x13b   :  { %v1952_v20 = vpop.f32.mrf.mxu0  ;;  %v688_v23 = vpop.f32.mrf.mxu1 }
 0x13c   :  { %766 = vst [vmem:[#allocation2 + $0xa8] sm:$0xff] %v1952_v20  ;;  %v892_v23 = vmul.f32 %v1928_v8, %v1928_v8  ;;  %v954_v48 = vadd.f32 %v953_v44, %v891_v36  ;;  %v829_v8 = vadd.f32 %v828_v56, %v1952_v20 }
 0x13d   :  { %v533_v27 = vpop.f32.mrf.mxu0  ;;  %v1958_v52 = vpop.f32.mrf.mxu1 }
 0x13e   :  { %798 = vst [vmem:[#allocation2 + $0x1a8] sm:$0xff] %v1958_v52  ;;  %v893_v27 = vmul.f32 %v1940_v25, %v1940_v25  ;;  %v955_v57 = vadd.f32 %v954_v48, %v892_v23 }
 0x13f   :  { %v536_v31 = vpop.f32.mrf.mxu0  ;;  %v693_v60 = vpop.f32.mrf.mxu1 }
 0x140   :  { %767 = vst [vmem:[#allocation2 + $0xb0] sm:$0xff] %v536_v31  ;;  %v894_v60 = vmul.f32 %v1952_v20, %v1952_v20  ;;  %v956_v0 = vadd.f32 %v955_v57, %v893_v27 }
 0x141   :  { %v538_v35 = vpop.f32.mrf.mxu0  ;;  %v1967_v4 = vpop.f32.mrf.mxu1 }
 0x142   :  { %799 = vst [vmem:[#allocation2 + $0x1b0] sm:$0xff] %v1967_v4  ;;  %v895_v35 = vmul.f32 %v536_v31, %v536_v31  ;;  %v957_v9 = vadd.f32 %v956_v0, %v894_v60 }
 0x143   :  { %v541_v39 = vpop.f32.mrf.mxu0  ;;  %v698_v12 = vpop.f32.mrf.mxu1 }
 0x144   :  { %768 = vst [vmem:[#allocation2 + $0xb8] sm:$0xff] %v541_v39  ;;  %v830_v12 = vadd.f32 %v829_v8, %v536_v31  ;;  %v896_v13 = vmul.f32 %v541_v39, %v541_v39  ;;  %v958_v16 = vadd.f32 %v957_v9, %v895_v35 }
 0x145   :  { %v543_v43 = vpop.f32.mrf.mxu0  ;;  %v1976_v19 = vpop.f32.mrf.mxu1 }
 0x146   :  { %800 = vst [vmem:[#allocation2 + $0x1b8] sm:$0xff] %v1976_v19  ;;  %v831_v43 = vadd.f32 %v830_v12, %v541_v39  ;;  %v959_v20 = vadd.f32 %v958_v16, %v896_v13 }
 0x147   :  { %v546_v47 = vpop.f32.mrf.mxu0  ;;  %v703_v29 = vpop.f32.mrf.mxu1 }
 0x148   :  { %769 = vst [vmem:[#allocation2 + $0xc0] sm:$0xff] %v546_v47  ;;  %v897_v24 = vmul.f32 %v546_v47, %v546_v47  ;;  %v832_v29 = vadd.f32 %v831_v43, %v546_v47 }
 0x149   :  { %v548_v51 = vpop.f32.mrf.mxu0  ;;  %v1985_v40 = vpop.f32.mrf.mxu1 }
 0x14a   :  { %801 = vst [vmem:[#allocation2 + $0x1c0] sm:$0xff] %v1985_v40  ;;  %v960_v31 = vadd.f32 %v959_v20, %v897_v24 }
 0x14b   :  { %v551_v55 = vpop.f32.mrf.mxu0  ;;  %v708_v45 = vpop.f32.mrf.mxu1 }
 0x14c   :  { %770 = vst [vmem:[#allocation2 + $0xc8] sm:$0xff] %v551_v55  ;;  %v898_v32 = vmul.f32 %v551_v55, %v551_v55  ;;  %v833_v51 = vadd.f32 %v832_v29, %v551_v55 }
 0x14d   :  { %v553_v59 = vpop.f32.mrf.mxu0  ;;  %v1994_v53 = vpop.f32.mrf.mxu1 }
 0x14e   :  { %802 = vst [vmem:[#allocation2 + $0x1c8] sm:$0xff] %v1994_v53  ;;  %v961_v39 = vadd.f32 %v960_v31, %v898_v32 }
 0x14f   :  { %v556_v61 = vpop.f32.mrf.mxu0  ;;  %v713_v63 = vpop.f32.mrf.mxu1 }
 0x150   :  { %771 = vst [vmem:[#allocation2 + $0xd0] sm:$0xff] %v556_v61  ;;  %v899_v44 = vmul.f32 %v556_v61, %v556_v61  ;;  %v834_v45 = vadd.f32 %v833_v51, %v556_v61 }
 0x151   :  { %v558_v5 = vpop.f32.mrf.mxu0  ;;  %v2001_v3 = vpop.f32.mrf.mxu1 }
 0x152   :  { %803 = vst [vmem:[#allocation2 + $0x1d0] sm:$0xff] %v2001_v3  ;;  %v962_v47 = vadd.f32 %v961_v39, %v899_v44 }
 0x153   :  { %v561_v25 = vpop.f32.mrf.mxu0  ;;  %v718_v7 = vpop.f32.mrf.mxu1 }
 0x154   :  { %772 = vst [vmem:[#allocation2 + $0xd8] sm:$0xff] %v561_v25  ;;  %v900_v48 = vmul.f32 %v561_v25, %v561_v25  ;;  %v835_v59 = vadd.f32 %v834_v45, %v561_v25 }
 0x155   :  { %v563_v11 = vpop.f32.mrf.mxu0  ;;  %v2004_v28 = vpop.f32.mrf.mxu1 }
 0x156   :  { %804 = vst [vmem:[#allocation2 + $0x1d8] sm:$0xff] %v2004_v28  ;;  %v963_v55 = vadd.f32 %v962_v47, %v900_v48 }
 0x157   :  { %v566_v15 = vpop.f32.mrf.mxu0  ;;  %v723_v36 = vpop.f32.mrf.mxu1 }
 0x158   :  { %773 = vst [vmem:[#allocation2 + $0xe0] sm:$0xff] %v566_v15  ;;  %v901_v57 = vmul.f32 %v566_v15, %v566_v15  ;;  %v836_v63 = vadd.f32 %v835_v59, %v566_v15  ;;  %v905_v15 = vmul.f32 %v1794_v22, %v1794_v22 }
 0x159   :  { %v568_v21 = vpop.f32.mrf.mxu0  ;;  %v2007_v23 = vpop.f32.mrf.mxu1 }
 0x15a   :  { %805 = vst [vmem:[#allocation2 + $0x1e0] sm:$0xff] %v2007_v23  ;;  %v964_v61 = vadd.f32 %v963_v55, %v901_v57 }
 0x15b   :  { %v571_v41 = vpop.f32.mrf.mxu0  ;;  %v728_v27 = vpop.f32.mrf.mxu1 }
 0x15c   :  { %774 = vst [vmem:[#allocation2 + $0xe8] sm:$0xff] %v571_v41  ;;  %v902_v0 = vmul.f32 %v571_v41, %v571_v41  ;;  %v837_v5 = vadd.f32 %v836_v63, %v571_v41 }
 0x15d   :  { %v573_v56 = vpop.f32.mrf.mxu0  ;;  %v2010_v60 = vpop.f32.mrf.mxu1 }
 0x15e   :  { %806 = vst [vmem:[#allocation2 + $0x1e8] sm:$0xff] %v2010_v60  ;;  %v965_v25 = vadd.f32 %v964_v61, %v902_v0 }
 0x15f   :  { %v576_v8 = vpop.f32.mrf.mxu0  ;;  %v733_v35 = vpop.f32.mrf.mxu1 }
 0x160   :  { %775 = vst [vmem:[#allocation2 + $0xf0] sm:$0xff] %v576_v8  ;;  %v903_v9 = vmul.f32 %v576_v8, %v576_v8  ;;  %v838_v7 = vadd.f32 %v837_v5, %v576_v8 }
 0x161   :  { %v578_v12 = vpop.f32.mrf.mxu0  ;;  %v2013_v13 = vpop.f32.mrf.mxu1 }
 0x162   :  { %807 = vst [vmem:[#allocation2 + $0x1f0] sm:$0xff] %v2013_v13  ;;  %v966_v24 = vadd.f32 %v965_v25, %v903_v9 }
 0x163   :  { %v581_v16 = vpop.f32.mrf.mxu0  ;;  %v738_v43 = vpop.f32.mrf.mxu1 }
 0x164   :  { %776 = vst [vmem:[#allocation2 + $0xf8] sm:$0xff] %v581_v16  ;;  %v839_v11 = vadd.f32 %v838_v7, %v581_v16  ;;  %v904_v20 = vmul.f32 %v581_v16, %v581_v16 }
 0x165   :  { %v583_v29 = vpop.f32.mrf.mxu0  ;;  %v2016_v32 = vpop.f32.mrf.mxu1 }
 0x166   :  { %v840_v36 = vadd.f32 %v839_v11, %v1794_v22  ;;  %v967_v31 = vadd.f32 %v966_v24, %v904_v20  ;;  %808 = vst [vmem:[#allocation2 + $0x1f8] sm:$0xff] %v2016_v32 }
 0x167   :  { %v743_v51 = vpop.f32.mrf.mxu1 }
 0x168   :  { %1164 = shalt.err (!%p1161_p4)
}
 0x169   :  { %s1219_s15 = smov 128   ;;  %s1220_s16 = smov 8   ;;  %v906_v22 = vmul.f32 %v1800_v26, %v1800_v26  ;;  %v841_v44 = vadd.f32 %v840_v36, %v1800_v26  ;;  %v968_v21 = vadd.f32 %v967_v31, %v905_v15  ;;  %v907_v39 = vmul.f32 %v1806_v30, %v1806_v30 }
 0x16a   :  { %1012 = dma.vmem_to_hbm [thread:$0]  %s1007_s13, 8192, %s2126_s2, [#allocation3], %s1219_s15, %s1219_s15, %s1220_s16   ;;  %v908_v41 = vmul.f32 %v1812_v34, %v1812_v34  ;;  %v909_v59 = vmul.f32 %v1818_v38, %v1818_v38  ;;  %v910_v26 = vmul.f32 %v1824_v42, %v1824_v42 }
 0x16b   :  { %v842_v45 = vadd.f32 %v841_v44, %v1806_v30  ;;  %v969_v48 = vadd.f32 %v968_v21, %v906_v22  ;;  %v911_v30 = vmul.f32 %v1830_v46, %v1830_v46  ;;  %v921_v44 = vmul.f32 %v1898_v33, %v1898_v33  ;;  %s1221_s2 = smov [#allocation4]   ;;  %s1222_s20 = smov [#allocation6]  }
 0x16c   :  { %s1019_s19 = sshll.u32 %s1221_s2, 4  ;;  %s1029_s21 = sshll.u32 %s1222_s20, 4  ;;  %s1020_s19 = int_to_ptr.vmem [resolvable:$true] %s1019_s19  ;;  %s1030_s21 = int_to_ptr.vmem [resolvable:$true] %s1029_s21 }
 0x16d   :  { %v843_v27 = vadd.f32 %v842_v45, %v1812_v34  ;;  %v970_v47 = vadd.f32 %v969_v48, %v907_v39  ;;  %v912_v34 = vmul.f32 %v1836_v50, %v1836_v50  ;;  %v922_v45 = vmul.f32 %v1910_v49, %v1910_v49  ;;  %s1173_s22 = scalar_lea.vmem %s1020_s19, 128  ;;  %p1178_p6 = scmp.lt.s32.totalorder %s1020_s19, %s1020_s19 }
 0x16e   :  { %p1174_p5 = scmp.ne.s32.totalorder %s1020_s19, %s1173_s22  ;;  %p1179_p7 = scmp.lt.s32.totalorder %s1173_s22, %s1173_s22 }
 0x16f   :  { %v844_v57 = vadd.f32 %v843_v27, %v1818_v38  ;;  %v971_v56 = vadd.f32 %v970_v47, %v908_v41  ;;  %v913_v38 = vmul.f32 %v1842_v54, %v1842_v54  ;;  %v923_v41 = vmul.f32 %v1922_v1, %v1922_v1 }
 0x170   :  { %v924_v47 = vmul.f32 %v1934_v17, %v1934_v17  ;;  %p1180_p8 = por %p1179_p7, %p1178_p6 }
 0x171   :  { %v845_v55 = vadd.f32 %v844_v57, %v1824_v42  ;;  %v972_v63 = vadd.f32 %v971_v56, %v909_v59  ;;  %v914_v42 = vmul.f32 %v1848_v58, %v1848_v58  ;;  %v925_v57 = vmul.f32 %v1946_v37, %v1946_v37 }
 0x172   :  { %p1181_p9 = pnand %p1180_p8, %p1174_p5 }
 0x173   :  { %v846_v0 = vadd.f32 %v845_v55, %v1830_v46  ;;  %v973_v8 = vadd.f32 %v972_v63, %v910_v26  ;;  %v915_v46 = vmul.f32 %v1854_v62, %v1854_v62  ;;  %v926_v26 = vmul.f32 %v1958_v52, %v1958_v52 }
 0x174   :  { %v927_v63 = vmul.f32 %v1967_v4, %v1967_v4 }
 0x175   :  { %v847_v35 = vadd.f32 %v846_v0, %v1836_v50  ;;  %v974_v61 = vadd.f32 %v973_v8, %v911_v30  ;;  %v916_v50 = vmul.f32 %v1860_v2, %v1860_v2  ;;  %v928_v0 = vmul.f32 %v1976_v19, %v1976_v19 }
 0x177   :  { %v975_v5 = vadd.f32 %v974_v61, %v912_v34  ;;  %v848_v9 = vadd.f32 %v847_v35, %v1842_v54  ;;  %v917_v54 = vmul.f32 %v1866_v6, %v1866_v6  ;;  %v929_v34 = vmul.f32 %v1985_v40, %v1985_v40 }
 0x178   :  { %v930_v61 = vmul.f32 %v1994_v53, %v1994_v53 }
 0x179   :  { %v849_v12 = vadd.f32 %v848_v9, %v1848_v58  ;;  %v976_v25 = vadd.f32 %v975_v5, %v913_v38  ;;  %v918_v58 = vmul.f32 %v1872_v10, %v1872_v10  ;;  %v931_v5 = vmul.f32 %v2001_v3, %v2001_v3 }
 0x17b   :  { %v850_v7 = vadd.f32 %v849_v12, %v1854_v62  ;;  %v977_v16 = vadd.f32 %v976_v25, %v914_v42  ;;  %v919_v62 = vmul.f32 %v1878_v14, %v1878_v14  ;;  %v932_v42 = vmul.f32 %v2004_v28, %v2004_v28 }
 0x17c   :  { %v933_v25 = vmul.f32 %v2007_v23, %v2007_v23 }
 0x17d   :  { %v851_v43 = vadd.f32 %v850_v7, %v1860_v2  ;;  %v978_v24 = vadd.f32 %v977_v16, %v915_v46  ;;  %v920_v2 = vmul.f32 %v1884_v18, %v1884_v18  ;;  %v934_v7 = vmul.f32 %v2010_v60, %v2010_v60 }
 0x17f   :  { %v852_v11 = vadd.f32 %v851_v43, %v1866_v6  ;;  %v979_v20 = vadd.f32 %v978_v24, %v916_v50  ;;  %v936_v50 = vmul.f32 %v2016_v32, %v2016_v32 }
 0x181   :  { %v853_v29 = vadd.f32 %v852_v11, %v1872_v10  ;;  %v980_v15 = vadd.f32 %v979_v20, %v917_v54 }
 0x183   :  { %v854_v36 = vadd.f32 %v853_v29, %v1878_v14  ;;  %v981_v31 = vadd.f32 %v980_v15, %v918_v58 }
 0x185   :  { %v855_v51 = vadd.f32 %v854_v36, %v1884_v18  ;;  %v982_v22 = vadd.f32 %v981_v31, %v919_v62 }
 0x187   :  { %v856_v6 = vadd.f32 %v855_v51, %v1898_v33  ;;  %v983_v21 = vadd.f32 %v982_v22, %v920_v2 }
 0x189   :  { %v984_v10 = vadd.f32 %v983_v21, %v921_v44  ;;  %v857_v39 = vadd.f32 %v856_v6, %v1910_v49 }
 0x18b   :  { %v985_v14 = vadd.f32 %v984_v10, %v922_v45  ;;  %v858_v48 = vadd.f32 %v857_v39, %v1922_v1 }
 0x18d   :  { %v986_v18 = vadd.f32 %v985_v14, %v923_v41  ;;  %v859_v27 = vadd.f32 %v858_v48, %v1934_v17 }
 0x18f   :  { %v987_v33 = vadd.f32 %v986_v18, %v924_v47  ;;  %v860_v59 = vadd.f32 %v859_v27, %v1946_v37 }
 0x191   :  { %v988_v56 = vadd.f32 %v987_v33, %v925_v57  ;;  %v861_v49 = vadd.f32 %v860_v59, %v1958_v52 }
 0x193   :  { %v989_v55 = vadd.f32 %v988_v56, %v926_v26  ;;  %v862_v1 = vadd.f32 %v861_v49, %v1967_v4 }
 0x195   :  { %v990_v30 = vadd.f32 %v989_v55, %v927_v63  ;;  %v863_v17 = vadd.f32 %v862_v1, %v1976_v19 }
 0x197   :  { %v991_v8 = vadd.f32 %v990_v30, %v928_v0  ;;  %v864_v37 = vadd.f32 %v863_v17, %v1985_v40 }
 0x199   :  { %v992_v35 = vadd.f32 %v991_v8, %v929_v34  ;;  %v865_v52 = vadd.f32 %v864_v37, %v1994_v53 }
 0x19b   :  { %v993_v38 = vadd.f32 %v992_v35, %v930_v61  ;;  %v866_v4 = vadd.f32 %v865_v52, %v2001_v3 }
 0x19d   :  { %v994_v9 = vadd.f32 %v993_v38, %v931_v5  ;;  %v867_v19 = vadd.f32 %v866_v4, %v2004_v28  ;;  %v935_v28 = vmul.f32 %v2013_v13, %v2013_v13 }
 0x19f   :  { %v995_v12 = vadd.f32 %v994_v9, %v932_v42  ;;  %v868_v40 = vadd.f32 %v867_v19, %v2007_v23 }
 0x1a1   :  { %v996_v46 = vadd.f32 %v995_v12, %v933_v25  ;;  %v869_v53 = vadd.f32 %v868_v40, %v2010_v60 }
 0x1a3   :  { %v997_v3 = vadd.f32 %v996_v46, %v934_v7  ;;  %v870_v16 = vadd.f32 %v869_v53, %v2013_v13 }
 0x1a5   :  { %v871_v23 = vadd.f32 %v870_v16, %v2016_v32  ;;  %v998_v43 = vadd.f32 %v997_v3, %v935_v28 }
 0x1a7   :  { %872 = vst [vmem:[#allocation4] sm:$0xff] %v871_v23  ;;  %v999_v24 = vadd.f32 %v998_v43, %v936_v50 }
 0x1a8   :  { %1184 = shalt.err (!%p1181_p9)
}
 0x1a9   :  { %1022 = dma.vmem_to_hbm [thread:$0]  %s1020_s19, 128, %s2127_s3, [#allocation5]   ;;  %1000 = vst [vmem:[#allocation6] sm:$0xff] %v999_v24 }
 0x1aa   :  { %s1193_s25 = scalar_lea.vmem %s1030_s21, 128  ;;  %p1198_p11 = scmp.lt.s32.totalorder %s1030_s21, %s1030_s21 }
 0x1ab   :  { %p1194_p10 = scmp.ne.s32.totalorder %s1030_s21, %s1193_s25  ;;  %p1199_p12 = scmp.lt.s32.totalorder %s1193_s25, %s1193_s25 }
 0x1ad   :  { %p1200_p13 = por %p1199_p12, %p1198_p11 }
 0x1af   :  { %p1201_p0 = pnand %p1200_p13, %p1194_p10 }
 0x1b1   :  { %1204 = shalt.err (!%p1201_p0)
}
 0x1b2   :  { %1032 = dma.vmem_to_hbm [thread:$0]  %s1030_s21, 128, %s2128_s4, [#allocation5]  }
 0x1b3   :  { %1213 = dma.done.wait [#allocation3], 8192  }
 0x1b4   :  { %1214 = vsyncadd [#allocation3], 4294959104 }
 0x1b5   :  { %1215 = dma.done.wait [#allocation5], 256  }
 0x1b6   :  { %1216 = vsyncadd [#allocation5], 4294967040 }
 0x1b7   :  { %1042 = vsyncpa [#allocation3], 1 }
 0x1b8   :  { %1043 = vsyncpa [#allocation5], 1 }

</bundles_post_ra>
